<compile_context>
chip_gen: v7x
topology: tpu7x:2x2x1
jax: 0.10.0
libtpu: 0.0.40
codegen_flags: <defaults>
</compile_context>

<pallas_src>
import functools
import math

import jax
import jax.numpy as jnp
from jax.experimental import pallas as pl
from jax.experimental.pallas import tpu as pltpu

_INV_SQRT2 = 1.0 / math.sqrt(2.0)
_SQRT_2_OVER_PI = math.sqrt(2.0 / math.pi)


def _round_up(a, b):
    return (a + b - 1) // b * b


def _cdiv(a, b):
    return (a + b - 1) // b


def _gelu(h, approx):
    if approx:
        # tanh-approx GELU: one EUP tanh + a handful of VALU ops. Keeps the VALU
        # slot free on v6e/v7x (exact erf lowers to a ~25-op f32 VPU polynomial).
        return 0.5 * h * (1.0 + jnp.tanh(_SQRT_2_OVER_PI * (h + 0.044715 * (h * h * h))))
    # exact GELU -- matches PyTorch nn.GELU() default (up to bf16 matmul error).
    return 0.5 * h * (1.0 + jax.lax.erf(h * _INV_SQRT2))


def _mlp_kernel_resident(x_ref, w1_ref, b1_ref, w2_ref, b2_ref, o_ref, *, approx_gelu):
    # Whole hidden dim in one step; W1/W2 block indices are constant across the grid,
    # so Pallas fetches them from HBM once and keeps them VMEM-resident.
    h = jnp.dot(x_ref[...], w1_ref[...], preferred_element_type=jnp.float32)
    h = h + b1_ref[...]                                  # bias in f32
    g = _gelu(h, approx_gelu)
    y = jnp.dot(g.astype(w2_ref.dtype), w2_ref[...], preferred_element_type=jnp.float32)
    o_ref[...] = (y + b2_ref[...]).astype(o_ref.dtype)
    # TODO(synk): dropout omitted -- module default drop=0.0 makes it identity.


def _mlp_kernel_streamed(x_ref, w1_ref, b1_ref, w2_ref, b2_ref, o_ref, acc_ref, *, approx_gelu):
    hk = pl.program_id(1)

    @pl.when(hk == 0)
    def _():
        acc_ref[...] = jnp.zeros_like(acc_ref)

    # fc1 partial over this hidden tile: bf16 MXU inputs, f32 accumulation.
    h = jnp.dot(x_ref[...], w1_ref[...], preferred_element_type=jnp.float32)
    h = h + b1_ref[...]
    g = _gelu(h, approx_gelu)
    # fc2 partial contraction over this hidden tile, accumulated in f32 scratch.
    acc_ref[...] += jnp.dot(g.astype(w2_ref.dtype), w2_ref[...],
                            preferred_element_type=jnp.float32)

    @pl.when(hk == pl.num_programs(1) - 1)
    def _():
        o_ref[...] = (acc_ref[...] + b2_ref[...]).astype(o_ref.dtype)


def _vmem_capacity_bytes():
    try:
        info = pltpu.get_tpu_info()
        cap = getattr(info, "vmem_capacity_bytes", None)
        if cap:
            return int(cap)
    except Exception:
        pass
    return 64 << 20  # conservative fallback (v7x per-TensorCore)


def _pad_to(a, shape):
    if tuple(a.shape) == tuple(shape):
        return a  # already aligned -> skip the pad pass entirely
    return jnp.pad(a, tuple((0, t - s) for s, t in zip(a.shape, shape)))


def mlp_pallas(x, w1, b1, w2, b2, *, tm=512, th=1024, gelu="tanh",
               weights_resident=None, compute_dtype=jnp.bfloat16):
    """Fused MLP. x: (B, N, C_in). w1: (C_in, H), w2: (H, C_out) -> (B, N, C_out).

    gelu="tanh" (default): tanh-approx GELU on the EUP slot (fast on v6e/v7x).
    gelu="erf": exact PyTorch nn.GELU() formula (f32 VPU polynomial).
    weights_resident: None = auto (fit-to-VMEM check), True/False = force.
    """
    B, N, C_in = x.shape
    H = w1.shape[1]
    C_out = w2.shape[1]
    out_dtype = x.dtype
    M = B * N
    approx_gelu = (gelu == "tanh")

    isz = jnp.dtype(compute_dtype).itemsize
    osz = jnp.dtype(out_dtype).itemsize

    # Lane-dense padding targets (last dims -> multiples of 128).
    C_in_p = _round_up(C_in, 128)
    C_out_p = _round_up(C_out, 128)
    H_128 = _round_up(H, 128)

    # Row tile: large (amortizes per-step overhead + weight DMA); keep >= 2 row
    # tiles when M is non-trivial so the 'parallel' row axis can use both v7x TCs.
    tm = max(16, _round_up(min(tm, _round_up(M, 16)), 16))
    if _cdiv(M, tm) < 2 and M >= 256:
        tm = max(128, _round_up(_cdiv(M, 2), 16))
    M_p = _round_up(M, tm)

    # VMEM budgeting, clamped to the actual chip (64 MiB/TC on v7x, 128 MiB on v5e/v6e).
    vmem_cap = _vmem_capacity_bytes()
    budget = min(vmem_cap - (16 << 20), 100 << 20)

    def footprint(tm_, th_, n_hidden_steps):
        w = 2 * (C_in_p * th_ + th_ * C_out_p) * isz      # double-buffered W1/W2 tiles
        b = 2 * 8 * (th_ + C_out_p) * 4                   # f32 bias tiles (8-sublane pad)
        xb = 2 * tm_ * C_in_p * isz                       # double-buffered x tile
        ob = 2 * tm_ * C_out_p * osz                      # double-buffered out tile
        inter = tm_ * th_ * (4 + isz)                     # f32 h/GELU + bf16 cast of g
        acc = tm_ * C_out_p * 4 if n_hidden_steps > 1 else 0
        return w + b + xb + ob + inter + acc

    # Weights-resident mode whenever it fits: avoids re-streaming W1/W2 from HBM
    # for every row tile (intensity per weight byte otherwise equals tm).
    if weights_resident is None:
        weights_resident = footprint(tm, H_128, 1) <= budget

    if weights_resident:
        th = H_128
        H_p = H_128
    else:
        th = max(128, _round_up(min(th, H_128), 128))
        while footprint(tm, th, _cdiv(H_128, th)) > budget and th > 128:
            th = max(128, th // 2)
        while footprint(tm, th, _cdiv(H_128, th)) > budget and tm > 128:
            tm = max(128, _round_up(tm // 2, 16))
            M_p = _round_up(M, tm)
        H_p = _round_up(H, th)

    # Pad + cast on the wrapper side (skipped when already aligned; zero padding
    # contributes nothing: GELU(0)=0 and padded rows are sliced off).
    # TODO(synk): for repeated calls, cache the padded bf16 weights outside this
    # function; kept inline here so the script stays self-contained.
    x2d = _pad_to(x.reshape(M, C_in), (M_p, C_in_p)).astype(compute_dtype)
    w1_p = _pad_to(w1, (C_in_p, H_p)).astype(compute_dtype)
    w2_p = _pad_to(w2, (H_p, C_out_p)).astype(compute_dtype)
    b1_p = _pad_to(b1.reshape(1, H), (1, H_p)).astype(jnp.float32)
    b2_p = _pad_to(b2.reshape(1, C_out), (1, C_out_p)).astype(jnp.float32)

    n_h = H_p // th
    need = footprint(tm, th, n_h)
    vmem_limit = int(min(vmem_cap, max(32 << 20, need + (16 << 20))))

    cost = pl.CostEstimate(
        flops=2 * M_p * (C_in_p * H_p + H_p * C_out_p),
        transcendentals=M_p * H_p,
        bytes_accessed=(x2d.size * isz + w1_p.size * isz + w2_p.size * isz
                        + b1_p.size * 4 + b2_p.size * 4 + M_p * C_out_p * osz),
    )

    if weights_resident:
        kernel = functools.partial(_mlp_kernel_resident, approx_gelu=approx_gelu)
        grid = (M_p // tm,)
        in_specs = [
            pl.BlockSpec((tm, C_in_p), lambda i: (i, 0)),      # x rows tile
            pl.BlockSpec((C_in_p, H_p), lambda i: (0, 0)),     # W1 (constant -> 1 fetch)
            pl.BlockSpec((1, H_p), lambda i: (0, 0)),          # b1
            pl.BlockSpec((H_p, C_out_p), lambda i: (0, 0)),    # W2 (constant -> 1 fetch)
            pl.BlockSpec((1, C_out_p), lambda i: (0, 0)),      # b2
        ]
        out_specs = pl.BlockSpec((tm, C_out_p), lambda i: (i, 0))
        scratch_shapes = []
        dim_sem = ("parallel",)
    else:
        kernel = functools.partial(_mlp_kernel_streamed, approx_gelu=approx_gelu)
        grid = (M_p // tm, H_p // th)    # rows parallel, hidden (reduction) axis last
        in_specs = [
            pl.BlockSpec((tm, C_in_p), lambda i, h: (i, 0)),   # x rows tile
            pl.BlockSpec((C_in_p, th), lambda i, h: (0, h)),   # W1 hidden tile
            pl.BlockSpec((1, th), lambda i, h: (0, h)),        # b1 hidden tile
            pl.BlockSpec((th, C_out_p), lambda i, h: (h, 0)),  # W2 hidden tile
            pl.BlockSpec((1, C_out_p), lambda i, h: (0, 0)),   # b2
        ]
        out_specs = pl.BlockSpec((tm, C_out_p), lambda i, h: (i, 0))
        scratch_shapes = [pltpu.VMEM((tm, C_out_p), jnp.float32)]
        dim_sem = ("parallel", "arbitrary")

    out2d = pl.pallas_call(
        kernel,
        out_shape=jax.ShapeDtypeStruct((M_p, C_out_p), out_dtype),
        grid_spec=pltpu.PrefetchScalarGridSpec(
            num_scalar_prefetch=0,
            grid=grid,
            in_specs=in_specs,
            out_specs=out_specs,
            scratch_shapes=scratch_shapes,
        ),
        compiler_params=pltpu.CompilerParams(
            dimension_semantics=dim_sem,
            vmem_limit_bytes=vmem_limit,
        ),
        cost_estimate=cost,
    )(x2d, w1_p, b1_p, w2_p, b2_p)

    return out2d[:M, :C_out].reshape(B, N, C_out)


def init_mlp_params(key, in_features, hidden_features, out_features):
    """Deterministic init matching nn.Linear default uniform(-1/sqrt(fan_in), ...)."""
    k1, k2, k3, k4 = jax.random.split(key, 4)
    lim1 = 1.0 / math.sqrt(in_features)
    lim2 = 1.0 / math.sqrt(hidden_features)
    # Stored as (in, out): kernel computes x @ W (PyTorch stores (out, in); x @ W.T).
    w1 = jax.random.uniform(k1, (in_features, hidden_features), jnp.float32, -lim1, lim1)
    b1 = jax.random.uniform(k2, (hidden_features,), jnp.float32, -lim1, lim1)
    w2 = jax.random.uniform(k3, (hidden_features, out_features), jnp.float32, -lim2, lim2)
    b2 = jax.random.uniform(k4, (out_features,), jnp.float32, -lim2, lim2)
    return w1, b1, w2, b2


def mlp_reference(x, w1, b1, w2, b2):
    h = jnp.einsum("bnc,ch->bnh", x, w1) + b1
    h = 0.5 * h * (1.0 + jax.lax.erf(h / jnp.sqrt(2.0)))
    return jnp.einsum("bnh,ho->bno", h, w2) + b2


if __name__ == "__main__":
    key = jax.random.PRNGKey(0)
    kx, kp, kx2, kp2 = jax.random.split(key, 4)

    # Test 1: small shapes (channels_last nn.Linear path), auto weights-resident, tanh GELU.
    B, N = 2, 8
    in_f, hid_f, out_f = 16, 32, 16
    x = jax.random.normal(kx, (B, N, in_f), jnp.float32)
    w1, b1, w2, b2 = init_mlp_params(kp, in_f, hid_f, out_f)
    out = jax.block_until_ready(mlp_pallas(x, w1, b1, w2, b2))
    ref = mlp_reference(x, w1, b1, w2, b2)
    assert out.shape == (B, N, out_f)
    assert jnp.allclose(out, ref, atol=5e-2, rtol=5e-2), "mismatch vs reference (test 1)"

    # Test 2: non-aligned shapes (padding path), exact-erf GELU (PyTorch default formula).
    B2, N2 = 2, 13
    inf2, hid2, outf2 = 40, 256, 24
    x2 = jax.random.normal(kx2, (B2, N2, inf2), jnp.float32)
    p2 = init_mlp_params(kp2, inf2, hid2, outf2)
    out2 = jax.block_until_ready(mlp_pallas(x2, *p2, gelu="erf"))
    ref2 = mlp_reference(x2, *p2)
    assert out2.shape == (B2, N2, outf2)
    assert jnp.allclose(out2, ref2, atol=5e-2, rtol=5e-2), "mismatch vs reference (test 2)"

    # Test 3: force the streamed (hidden-tiled) path with a multi-step f32 accumulation.
    out3 = jax.block_until_ready(mlp_pallas(x2, *p2, th=128, weights_resident=False))
    assert jnp.allclose(out3, ref2, atol=5e-2, rtol=5e-2), "mismatch vs reference (test 3)"

    print("KERNEL_OK")
</pallas_src>

<mosaic_0001>
module attributes {stable_mosaic.version = 11 : i64} {
  func.func @_mlp_kernel_resident(%arg0: i32, %arg1: memref<16x128xbf16, #tpu.memory_space<vmem>>, %arg2: memref<128x128xbf16, #tpu.memory_space<vmem>>, %arg3: memref<1x128xf32, #tpu.memory_space<vmem>>, %arg4: memref<128x128xbf16, #tpu.memory_space<vmem>>, %arg5: memref<1x128xf32, #tpu.memory_space<vmem>>, %arg6: memref<16x128xf32, #tpu.memory_space<vmem>>) attributes {dimension_semantics = [#tpu.dimension_semantics<parallel>], iteration_bounds = array<i64: 1>, scalar_prefetch = 0 : i64, scratch_operands = 0 : i64, tpu.core_type = #tpu.core_type<tc>, window_params = [{transform_indices = @transform_0, window_bounds = array<i64: 16, 128>}, {pipeline_mode = #tpu.pipeline_mode<synchronous>, transform_indices = @transform_1, window_bounds = array<i64: 128, 128>}, {pipeline_mode = #tpu.pipeline_mode<synchronous>, transform_indices = @transform_2, window_bounds = array<i64: 1, 128>}, {pipeline_mode = #tpu.pipeline_mode<synchronous>, transform_indices = @transform_3, window_bounds = array<i64: 128, 128>}, {pipeline_mode = #tpu.pipeline_mode<synchronous>, transform_indices = @transform_4, window_bounds = array<i64: 1, 128>}, {transform_indices = @transform_5, window_bounds = array<i64: 16, 128>}]} {
    %c0 = arith.constant 0 : index
    %c0_0 = arith.constant 0 : index
    %0 = vector.load %arg1[%c0, %c0_0] : memref<16x128xbf16, #tpu.memory_space<vmem>>, vector<16x128xbf16>
    %c0_1 = arith.constant 0 : index
    %c0_2 = arith.constant 0 : index
    %1 = vector.load %arg2[%c0_1, %c0_2] : memref<128x128xbf16, #tpu.memory_space<vmem>>, vector<128x128xbf16>
    %cst = arith.constant dense<0.000000e+00> : vector<16x128xf32>
    %2 = tpu.matmul %0, %1, %cst {dimension_numbers = #tpu.dot_dimension_numbers<[1], [0], [0], [1], [0, 0, 1, 1], [], []>} : vector<16x128xbf16>, vector<128x128xbf16>, vector<16x128xf32> -> vector<16x128xf32>
    %c0_3 = arith.constant 0 : index
    %c0_4 = arith.constant 0 : index
    %3 = vector.load %arg3[%c0_3, %c0_4] : memref<1x128xf32, #tpu.memory_space<vmem>>, vector<1x128xf32>
    %4 = vector.broadcast %3 : vector<1x128xf32> to vector<16x128xf32>
    %5 = arith.addf %2, %4 : vector<16x128xf32>
    %cst_5 = arith.constant 5.000000e-01 : f32
    %6 = vector.broadcast %cst_5 : f32 to vector<16x128xf32>
    %7 = arith.mulf %6, %5 : vector<16x128xf32>
    %8 = arith.mulf %5, %5 : vector<16x128xf32>
    %9 = arith.mulf %8, %5 : vector<16x128xf32>
    %cst_6 = arith.constant 4.471500e-02 : f32
    %10 = vector.broadcast %cst_6 : f32 to vector<16x128xf32>
    %11 = arith.mulf %10, %9 : vector<16x128xf32>
    %12 = arith.addf %5, %11 : vector<16x128xf32>
    %cst_7 = arith.constant 0.797884583 : f32
    %13 = vector.broadcast %cst_7 : f32 to vector<16x128xf32>
    %14 = arith.mulf %13, %12 : vector<16x128xf32>
    %15 = math.tanh %14 : vector<16x128xf32>
    %cst_8 = arith.constant 1.000000e+00 : f32
    %16 = vector.broadcast %cst_8 : f32 to vector<16x128xf32>
    %17 = arith.addf %16, %15 : vector<16x128xf32>
    %18 = arith.mulf %7, %17 : vector<16x128xf32>
    %19 = arith.truncf %18 : vector<16x128xf32> to vector<16x128xbf16>
    %c0_9 = arith.constant 0 : index
    %c0_10 = arith.constant 0 : index
    %20 = vector.load %arg4[%c0_9, %c0_10] : memref<128x128xbf16, #tpu.memory_space<vmem>>, vector<128x128xbf16>
    %cst_11 = arith.constant dense<0.000000e+00> : vector<16x128xf32>
    %21 = tpu.matmul %19, %20, %cst_11 {dimension_numbers = #tpu.dot_dimension_numbers<[1], [0], [0], [1], [0, 0, 1, 1], [], []>} : vector<16x128xbf16>, vector<128x128xbf16>, vector<16x128xf32> -> vector<16x128xf32>
    %c0_12 = arith.constant 0 : index
    %c0_13 = arith.constant 0 : index
    %22 = vector.load %arg5[%c0_12, %c0_13] : memref<1x128xf32, #tpu.memory_space<vmem>>, vector<1x128xf32>
    %23 = vector.broadcast %22 : vector<1x128xf32> to vector<16x128xf32>
    %24 = arith.addf %21, %23 : vector<16x128xf32>
    %c0_14 = arith.constant 0 : index
    %c0_15 = arith.constant 0 : index
    %25 = vector.load %arg6[%c0_14, %c0_15] : memref<16x128xf32, #tpu.memory_space<vmem>>, vector<16x128xf32>
    tpu.vector_store %arg6[%c0_14, %c0_15], %24 {strides = array<i32>} : memref<16x128xf32, #tpu.memory_space<vmem>>, vector<16x128xf32>,
    return
  }
  func.func @transform_0(%arg0: i32) -> (i32, i32) {
    %c0_i32 = arith.constant 0 : i32
    %c0_i32_0 = arith.constant 0 : i32
    return %arg0, %c0_i32 : i32, i32
  }
  func.func @transform_1(%arg0: i32) -> (i32, i32) {
    %c0_i32 = arith.constant 0 : i32
    %c0_i32_0 = arith.constant 0 : i32
    %c0_i32_1 = arith.constant 0 : i32
    return %c0_i32, %c0_i32_0 : i32, i32
  }
  func.func @transform_2(%arg0: i32) -> (i32, i32) {
    %c0_i32 = arith.constant 0 : i32
    %c0_i32_0 = arith.constant 0 : i32
    %c0_i32_1 = arith.constant 0 : i32
    return %c0_i32, %c0_i32_0 : i32, i32
  }
  func.func @transform_3(%arg0: i32) -> (i32, i32) {
    %c0_i32 = arith.constant 0 : i32
    %c0_i32_0 = arith.constant 0 : i32
    %c0_i32_1 = arith.constant 0 : i32
    return %c0_i32, %c0_i32_0 : i32, i32
  }
  func.func @transform_4(%arg0: i32) -> (i32, i32) {
    %c0_i32 = arith.constant 0 : i32
    %c0_i32_0 = arith.constant 0 : i32
    %c0_i32_1 = arith.constant 0 : i32
    return %c0_i32, %c0_i32_0 : i32, i32
  }
  func.func @transform_5(%arg0: i32) -> (i32, i32) {
    %c0_i32 = arith.constant 0 : i32
    %c0_i32_0 = arith.constant 0 : i32
    return %arg0, %c0_i32 : i32, i32
  }
}

</mosaic_0001>

<bundles_post_ra>
// kernel: tpu_custom_call.1
= control target key start
LH: loop header
LB: loop body
LE: loop exit
PB: predicated region body
PF: predicated region fallthrough
CT: control target
= control target key end

     0   :  { %10 = vsyncpa [#allocation3], 0  ;;  %s646_s0 = inlined_call_operand.hbm [shape: bf16[16,128], index: 0, kind: input, shape index: {}]   ;;  %s647_s1 = inlined_call_operand.hbm [shape: bf16[128,128], index: 1, kind: input, shape index: {}]   ;;  %s648_s2 = inlined_call_operand.vmem [shape: f32[1,128], index: 2, kind: input, shape index: {}]   ;;  %s649_s3 = inlined_call_operand.hbm [shape: bf16[128,128], index: 3, kind: input, shape index: {}]   ;;  %s650_s4 = inlined_call_operand.vmem [shape: f32[1,128], index: 4, kind: input, shape index: {}]   ;;  %s651_s5 = inlined_call_operand.hbm [shape: f32[16,128], index: 5, kind: output, shape index: {}]  }
   0x1   :  { %11 = vsyncpa [#allocation6], 0 }
   0x2   :  { %12 = vsyncpa [#allocation4], 0  ;;  %s536_s18 = smov [#allocation5]   ;;  %s537_s20 = smov [#allocation2]  }
   0x3   :  { %s30_s19 = sshll.u32 %s536_s18, 4  ;;  %s18_s21 = sshll.u32 %s537_s20, 4  ;;  %s31_s19 = int_to_ptr.vmem [resolvable:$true] %s30_s19  ;;  %s576_s21 = int_to_ptr.vmem [resolvable:$true] %s18_s21 }
   0x4   :  { %s442_s24 = scalar_lea.hbm %s647_s1, 1024 }
   0x5   :  { %p443_p0 = scmp.ne.s32.totalorder %s647_s1, %s442_s24  ;;  %p446_p1 = scmp.lt.u32.totalorder %s442_s24, %s647_s1 }
   0x7   :  { %p448_p2 = pnand %p446_p1, %p443_p0 }
   0x9   :  { %451 = shalt.err (!%p448_p2)
}
   0xa   :  { %s452_s29 = scalar_lea.vmem %s31_s19, 1024  ;;  %p457_p4 = scmp.lt.s32.totalorder %s31_s19, %s31_s19 }
   0xb   :  { %p453_p3 = scmp.ne.s32.totalorder %s31_s19, %s452_s29  ;;  %p458_p5 = scmp.lt.s32.totalorder %s452_s29, %s452_s29 }
   0xd   :  { %p459_p6 = por %p458_p5, %p457_p4 }
   0xf   :  { %p460_p7 = pnand %p459_p6, %p453_p3 }
  0x11   :  { %463 = shalt.err (!%p460_p7)
}
  0x12   :  { %s538_s30 = smov 64   ;;  %s539_s6 = smov 4  }
  0x13   :  { %36 = dma.hbm_to_vmem [thread:$0]  %s647_s1, 1024, %s31_s19, [#allocation6], %s538_s30, %s538_s30, %s539_s6  }
  0x14   :  { %s464_s11 = scalar_lea.hbm %s646_s0, 128 }
  0x15   :  { %p465_p8 = scmp.ne.s32.totalorder %s646_s0, %s464_s11  ;;  %p468_p9 = scmp.lt.u32.totalorder %s464_s11, %s646_s0 }
  0x17   :  { %p470_p10 = pnand %p468_p9, %p465_p8 }
  0x19   :  { %473 = shalt.err (!%p470_p10)
}
  0x1a   :  { %s474_s16 = scalar_lea.vmem %s576_s21, 128  ;;  %p479_p12 = scmp.lt.s32.totalorder %s576_s21, %s576_s21 }
  0x1b   :  { %p475_p11 = scmp.ne.s32.totalorder %s576_s21, %s474_s16  ;;  %p480_p13 = scmp.lt.s32.totalorder %s474_s16, %s474_s16 }
  0x1d   :  { %p481_p0 = por %p480_p13, %p479_p12 }
  0x1f   :  { %p482_p1 = pnand %p481_p0, %p475_p11 }
  0x21   :  { %485 = shalt.err (!%p482_p1)
}
  0x22   :  { %24 = dma.hbm_to_vmem [thread:$0]  %s646_s0, 128, %s576_s21, [#allocation3], %s538_s30, %s538_s30, %s539_s6  }
  0x23   :  { %s540_s18 = smov [#allocation7]   ;;  %s486_s23 = scalar_lea.hbm %s649_s3, 1024 }
  0x24   :  { %s44_s19 = sshll.u32 %s540_s18, 4  ;;  %p487_p2 = scmp.ne.s32.totalorder %s649_s3, %s486_s23  ;;  %s45_s19 = int_to_ptr.vmem [resolvable:$true] %s44_s19 }
  0x25   :  { %p490_p3 = scmp.lt.u32.totalorder %s486_s23, %s649_s3 }
  0x27   :  { %p492_p4 = pnand %p490_p3, %p487_p2 }
  0x29   :  { %495 = shalt.err (!%p492_p4)
}
  0x2a   :  { %s496_s28 = scalar_lea.vmem %s45_s19, 1024  ;;  %p501_p6 = scmp.lt.s32.totalorder %s45_s19, %s45_s19 }
  0x2b   :  { %p497_p5 = scmp.ne.s32.totalorder %s45_s19, %s496_s28  ;;  %p502_p7 = scmp.lt.s32.totalorder %s496_s28, %s496_s28 }
  0x2d   :  { %p503_p8 = por %p502_p7, %p501_p6 }
  0x2f   :  { %p504_p9 = pnand %p503_p8, %p497_p5 }
  0x31   :  { %507 = shalt.err (!%p504_p9)
}
  0x32   :  { %50 = dma.hbm_to_vmem [thread:$0]  %s649_s3, 1024, %s45_s19, [#allocation6], %s538_s30, %s538_s30, %s539_s6  }
  0x33   :  { %530 = dma.done.wait [#allocation3], 128  }
  0x34   :  { %531 = vsyncadd [#allocation3], 4294967168 }
  0x35   :  { %532 = dma.done.wait [#allocation6], 2048  }
  0x36   :  { %533 = vsyncadd [#allocation6], 4294965248  ;;  %v541_v0 = vmov 0.0   ;;  %vm542_vm0 = vmmov 0   ;;  %v421_v1 = vld [vmem:[#allocation5] sm:$0xff]   ;;  %v422_v2 = vld [vmem:[#allocation5 + $0x8] sm:$0xff]  }
  0x37   :  { %371 = vmatprep.subr.bf16.mxu0 %v541_v0  ;;  %387 = vmatprep.mubr.msk.bf16.mxu0 %vm542_vm0, %v541_v0  ;;  %v423_v3 = vld [vmem:[#allocation5 + $0x10] sm:$0xff]   ;;  %v424_v4 = vld [vmem:[#allocation5 + $0x18] sm:$0xff]   ;;  %v425_v5 = vld [vmem:[#allocation5 + $0x20] sm:$0xff]   ;;  %s543_s6 = smov [#allocation8]  }
  0x38   :  { %391 = vmatprep.subr.bf16.mxu1 %v541_v0  ;;  %407 = vmatprep.mubr.msk.bf16.mxu1 %vm542_vm0, %v541_v0  ;;  %v426_v6 = vld [vmem:[#allocation5 + $0x28] sm:$0xff]   ;;  %v427_v7 = vld [vmem:[#allocation5 + $0x30] sm:$0xff]   ;;  %v428_v8 = vld [vmem:[#allocation5 + $0x38] sm:$0xff]   ;;  %s321_s7 = sshll.u32 %s543_s6, 4  ;;  %s322_s7 = int_to_ptr.vmem [resolvable:$true] %s321_s7 }
  0x39   :  { %372 = vmatpush3.bf16.msra.mxu0 %v421_v1  ;;  %v429_v9 = vld [vmem:[#allocation2] sm:$0xff]   ;;  %v430_v10 = vld [vmem:[#allocation7] sm:$0xff]   ;;  %v431_v11 = vld [vmem:[#allocation7 + $0x8] sm:$0xff]   ;;  %s508_s8 = scalar_lea.vmem %s322_s7, 256  ;;  %p513_p11 = scmp.lt.s32.totalorder %s322_s7, %s322_s7 }
  0x3a   :  { %373 = vmatprep.subr.bf16.mxu0 %v541_v0  ;;  %392 = vmatpush3.bf16.msra.mxu1 %v430_v10  ;;  %v432_v12 = vld [vmem:[#allocation7 + $0x10] sm:$0xff]   ;;  %v433_v13 = vld [vmem:[#allocation7 + $0x18] sm:$0xff]   ;;  %v434_v14 = vld [vmem:[#allocation7 + $0x20] sm:$0xff]   ;;  %p509_p10 = scmp.ne.s32.totalorder %s322_s7, %s508_s8  ;;  %p514_p12 = scmp.lt.s32.totalorder %s508_s8, %s508_s8 }
  0x3b   :  { %393 = vmatprep.subr.bf16.mxu1 %v541_v0  ;;  %v435_v15 = vld [vmem:[#allocation7 + $0x28] sm:$0xff]   ;;  %v436_v16 = vld [vmem:[#allocation7 + $0x30] sm:$0xff]   ;;  %v437_v17 = vld [vmem:[#allocation7 + $0x38] sm:$0xff]  }
  0x3c   :  { %v334_v18 = vld [vmem:[%s648_s2] ss:$0 sm:$0xff]  ;;  %p515_p13 = por %p514_p12, %p513_p11 }
  0x3d   :  { %374 = vmatpush3.bf16.msra.mxu0 %v422_v2  ;;  %v344_v44 = vld [vmem:[%s650_s4] ss:$0 sm:$0xff] }
  0x3e   :  { %375 = vmatprep.subr.bf16.mxu0 %v541_v0  ;;  %394 = vmatpush3.bf16.msra.mxu1 %v431_v11  ;;  %p516_p0 = pnand %p515_p13, %p509_p10 }
  0x3f   :  { %395 = vmatprep.subr.bf16.mxu1 %v541_v0 }
  0x41   :  { %376 = vmatpush3.bf16.msra.mxu0 %v423_v3 }
  0x42   :  { %377 = vmatprep.subr.bf16.mxu0 %v541_v0  ;;  %396 = vmatpush3.bf16.msra.mxu1 %v432_v12 }
  0x43   :  { %397 = vmatprep.subr.bf16.mxu1 %v541_v0 }
  0x45   :  { %378 = vmatpush3.bf16.msra.mxu0 %v424_v4 }
  0x46   :  { %379 = vmatprep.subr.bf16.mxu0 %v541_v0  ;;  %398 = vmatpush3.bf16.msra.mxu1 %v433_v13 }
  0x47   :  { %399 = vmatprep.subr.bf16.mxu1 %v541_v0 }
  0x49   :  { %380 = vmatpush3.bf16.msra.mxu0 %v425_v5 }
  0x4a   :  { %381 = vmatprep.subr.bf16.mxu0 %v541_v0  ;;  %400 = vmatpush3.bf16.msra.mxu1 %v434_v14 }
  0x4b   :  { %401 = vmatprep.subr.bf16.mxu1 %v541_v0 }
  0x4d   :  { %382 = vmatpush3.bf16.msra.mxu0 %v426_v6 }
  0x4e   :  { %383 = vmatprep.subr.bf16.mxu0 %v541_v0  ;;  %402 = vmatpush3.bf16.msra.mxu1 %v435_v15 }
  0x4f   :  { %403 = vmatprep.subr.bf16.mxu1 %v541_v0 }
  0x51   :  { %384 = vmatpush3.bf16.msra.mxu0 %v427_v7 }
  0x52   :  { %385 = vmatprep.subr.bf16.mxu0 %v541_v0  ;;  %404 = vmatpush3.bf16.msra.mxu1 %v436_v16 }
  0x53   :  { %405 = vmatprep.subr.bf16.mxu1 %v541_v0 }
  0x55   :  { %386 = vmatpush3.bf16.msra.mxu0 %v428_v8 }
  0x56   :  { %406 = vmatpush3.bf16.msra.mxu1 %v437_v17 }
  0x58   :  { %388 = vmatmul.mubr.bf16.vlgmr.msra.gmra.mrb[0].mxu0 %v429_v9 }
 0x12b   :  { %v176_v19 = vpop.f32.mrb[0].mxu0 }
 0x12c   :  { %v177_v20 = vadd.f32 %v334_v18, %v176_v19  ;;  %v389_v21 = vpop.f32.mrb[1].mxu0 }
 0x12d   :  { %v179_v22 = vpop.f32.mrb[2].mxu0 }
 0x12e   :  { %v185_v23 = vmul.f32 %v177_v20, %v177_v20  ;;  %v180_v24 = vadd.f32 %v334_v18, %v179_v22  ;;  %v390_v25 = vpop.f32.mrb[3].mxu0  ;;  %v183_v38 = vmul.f32 0.5, %v177_v20 }
 0x130   :  { %v187_v26 = vmul.f32 %v185_v23, %v177_v20  ;;  %v186_v27 = vmul.f32 %v180_v24, %v180_v24  ;;  %v184_v39 = vmul.f32 0.5, %v180_v24 }
 0x132   :  { %v189_v28 = vmul.f32 0.044715, %v187_v26  ;;  %v188_v29 = vmul.f32 %v186_v27, %v180_v24 }
 0x134   :  { %v191_v30 = vadd.f32 %v189_v28, %v177_v20  ;;  %v190_v31 = vmul.f32 0.044715, %v188_v29 }
 0x136   :  { %v193_v32 = vmul.f32 0.7978846, %v191_v30  ;;  %v192_v33 = vadd.f32 %v190_v31, %v180_v24 }
 0x138   :  { %438 = vtanh.f32 %v193_v32  ;;  %v194_v34 = vmul.f32 0.7978846, %v192_v33 }
 0x13a   :  { %440 = vtanh.f32 %v194_v34 }
 0x142   :  { %v439_v35 = vpop.eup %438 }
 0x143   :  { %v197_v36 = vadd.f32 1.0, %v439_v35 }
 0x144   :  { %v441_v37 = vpop.eup %440 }
 0x145   :  { %v198_v40 = vadd.f32 1.0, %v441_v37  ;;  %v199_v41 = vmul.f32 %v197_v36, %v183_v38 }
 0x147   :  { %v200_v42 = vmul.f32 %v198_v40, %v184_v39 }
 0x149   :  { %v201_v43 = vpack.c.bf16 %v200_v42, %v199_v41 }
 0x14b   :  { %408 = vmatmul.mubr.bf16.vlgmr.msra.gmra.mrb[0].mxu1 %v201_v43 }
 0x21e   :  { %v307_v45 = vpop.f32.mrb[0].mxu1 }
 0x21f   :  { %v308_v46 = vadd.f32 %v344_v44, %v307_v45  ;;  %v409_v47 = vpop.f32.mrb[1].mxu1 }
 0x220   :  { %v310_v48 = vpop.f32.mrb[2].mxu1 }
 0x221   :  { %314 = vst [vmem:[#allocation8] sm:$0xff] %v308_v46  ;;  %v311_v49 = vadd.f32 %v344_v44, %v310_v48  ;;  %v410_v50 = vpop.f32.mrb[3].mxu1 }
 0x223   :  { %315 = vst [vmem:[#allocation8 + $0x8] sm:$0xff] %v311_v49 }
 0x224   :  { %519 = shalt.err (!%p516_p0)
}
 0x225   :  { %s520_s10 = scalar_lea.hbm %s651_s5, 256 }
 0x226   :  { %p521_p1 = scmp.ne.s32.totalorder %s651_s5, %s520_s10  ;;  %p524_p2 = scmp.lt.u32.totalorder %s520_s10, %s651_s5 }
 0x228   :  { %p526_p3 = pnand %p524_p2, %p521_p1 }
 0x22a   :  { %529 = shalt.err (!%p526_p3)
}
 0x22b   :  { %s544_s15 = smov 128   ;;  %s545_s16 = smov 8  }
 0x22c   :  { %327 = dma.vmem_to_hbm [thread:$0]  %s322_s7, 256, %s651_s5, [#allocation4], %s544_s15, %s544_s15, %s545_s16  }
 0x22d   :  { %534 = dma.done.wait [#allocation4], 256  }
 0x22e   :  { %535 = vsyncadd [#allocation4], 4294967040 }
 0x22f   :  { %331 = vsyncpa [#allocation3], 1 }
 0x230   :  { %332 = vsyncpa [#allocation6], 1 }
 0x231   :  { %333 = vsyncpa [#allocation4], 1 }

</bundles_post_ra>
